<compile_context>
chip_gen: v7x
topology: tpu7x:2x2x1
jax: 0.10.0
libtpu: 0.0.40
codegen_flags: <defaults>
</compile_context>

<pallas_src>
import functools

import jax
import jax.numpy as jnp
from jax.experimental import pallas as pl
from jax.experimental.pallas import tpu as pltpu


def _silhouette_kernel(theta_ref, fv_ref, ref_ref,
                       w1_ref, b1_ref, w2_ref, b2_ref,
                       wd_fv_ref, wd_nv_ref, bd_ref,
                       sig_ref, loss_part_ref,
                       *, use_mxu_fv, needs_mask, s_valid):
    """Grid = (batch, spatial_outer, spatial_inner). Channels on sublanes, spatial on
    lanes. Fuses the two 1x1 convs, the decoder projection, sigmoid, and the
    per-(batch, outer) BCE-with-logits lane-partial accumulation."""
    si = pl.program_id(2)

    @pl.when(si == 0)
    def _():
        loss_part_ref[...] = jnp.zeros_like(loss_part_ref)

    # null_vector = relu(fv_2(relu(fv_1(theta))))  (1x1 convs == channel matmuls)
    theta = theta_ref[...].astype(jnp.float32)                         # (2, ts)
    # K=2 contraction done on the VPU (broadcast FMAs) instead of a padded MXU matmul.
    h1 = jnp.maximum(
        w1_ref[:, 0:1] * theta[0:1, :]
        + w1_ref[:, 1:2] * theta[1:2, :]
        + b1_ref[...], 0.0)                                            # (32, ts)
    nv = jnp.maximum(
        jnp.dot(w2_ref[...], h1, preferred_element_type=jnp.float32)
        + b2_ref[...], 0.0)                                            # (32, ts)

    # decoder(cat([fv_height, null_vector], channel)) -> 1 logit channel.
    # concat + 1x1 conv == split-weight contraction over fv channels + nv channels.
    if use_mxu_fv:
        # (8, C) @ (C, ts) in the stream dtype (bf16/f32), f32 accumulation; row 0
        # holds the real weights, rows 1..7 are zero padding for the MXU.
        fv_term = jnp.dot(wd_fv_ref[...], fv_ref[...],
                          preferred_element_type=jnp.float32)[0:1, :]  # (1, ts)
    else:
        fv_term = jnp.sum(fv_ref[...].astype(jnp.float32) * wd_fv_ref[...],
                          axis=0, keepdims=True)                       # (1, ts)
    xc = (fv_term
          + jnp.sum(nv * wd_nv_ref[...], axis=0, keepdims=True)
          + bd_ref[...])                                               # (1, ts)

    # BCEWithLogitsLoss (numerically stable) + sigmoid, sharing exp(-|xc|).
    y = ref_ref[...].astype(jnp.float32)                               # (1, ts)
    e = jnp.exp(-jnp.abs(xc))
    bce = jnp.maximum(xc, 0.0) - xc * y + jnp.log1p(e)
    if needs_mask:
        tile_idx = pl.program_id(1) * pl.num_programs(2) + si
        lane = jax.lax.broadcasted_iota(jnp.int32, bce.shape, 1)
        off = tile_idx * bce.shape[1] + lane
        bce = jnp.where(off < s_valid, bce, 0.0)
    loss_part_ref[...] += bce     # resident across the inner (reduction) axis, f32

    inv = 1.0 / (1.0 + e)
    sig_ref[...] = jnp.where(xc >= 0.0, inv, e * inv).astype(sig_ref.dtype)


def init_params(key, num_input_channels):
    """Deterministic synthetic parameters matching the module's layer shapes
    (PyTorch Conv2d weight layout (out, in)):
    fv_1: Conv2d(2, 32, 1), fv_2: Conv2d(32, 32, 1),
    decoder stand-in: Conv2d(num_input_channels + 32, 1, 1) (split into fv/nv parts)."""
    ks = jax.random.split(key, 7)
    s = 0.1
    w1 = jax.random.normal(ks[0], (32, 2), jnp.float32) * s
    b1 = jax.random.normal(ks[1], (32, 1), jnp.float32) * s
    w2 = jax.random.normal(ks[2], (32, 32), jnp.float32) * s
    b2 = jax.random.normal(ks[3], (32, 1), jnp.float32) * s
    wd_fv = jax.random.normal(ks[4], (num_input_channels, 1), jnp.float32) * s
    wd_nv = jax.random.normal(ks[5], (32, 1), jnp.float32) * s
    bd = jax.random.normal(ks[6], (1, 1), jnp.float32) * s
    return (w1, b1, w2, b2, wd_fv, wd_nv, bd)


def _vmem_capacity_bytes():
    """Per-TensorCore VMEM capacity for the current generation; conservative 64 MiB
    (the v7x value) if the query is unavailable."""
    try:
        info = pltpu.get_tpu_info()
        for attr in ("vmem_capacity_bytes", "vmem_size_bytes"):
            cap = getattr(info, attr, None)
            if cap:
                return int(cap)
    except Exception:
        pass
    return 64 << 20


def _choose_tile(S, C, in_item, out_item, vmem_cap, target_block_bytes):
    """Lane-tile size: multiple of 128, sized so the fv block is ~target_block_bytes,
    clamped to the (padded) spatial extent and to ~45% of this generation's VMEM.
    Returns (tile_s, vmem_bytes_needed_at_that_tile)."""
    s_cap = max(128, -(-S // 128) * 128)
    ts = max(128, (target_block_bytes // max(C * in_item, 1)) // 128 * 128)
    ts = min(ts, s_cap)

    def need(t):
        stream = 2 * t * in_item * (C + 2 + 1)   # fv + theta + ref, double-buffered
        outs = 2 * t * out_item + 2 * t * 4      # sigmoid block + loss lane-partials
        return stream + outs + (1 << 20)         # weights + headroom

    budget = int(vmem_cap * 0.45)
    while ts > 128 and need(ts) > budget:
        ts -= 128
    return ts, need(ts)


def silhouette_prediction(theta, fv_height, ref_seg, params,
                          target_block_bytes=3 << 20):
    """theta: (N,2,H,W), fv_height: (N,C,H,W), ref_seg: (N,1,H,W)  (NCHW, like PyTorch).
    Inputs are streamed in their native dtype. Returns
    (scalar BCE-with-logits loss [f32], sigmoid(xc) as (N,1,H,W) in fv_height.dtype)."""
    N, two, H, W = theta.shape
    assert two == 2
    C = fv_height.shape[1]
    S = H * W

    in_dtype = fv_height.dtype
    out_dtype = fv_height.dtype
    in_item = jnp.dtype(in_dtype).itemsize
    out_item = jnp.dtype(out_dtype).itemsize

    vmem_cap = _vmem_capacity_bytes()
    ts, vmem_need = _choose_tile(S, C, in_item, out_item, vmem_cap, target_block_bytes)
    S_pad = -(-S // ts) * ts
    needs_mask = (S_pad != S)

    # NCHW consumed directly: reshape only (free). Pad the spatial tail only when S
    # is not tile-aligned; the padded BCE contribution is masked in-kernel.
    theta_f = theta.reshape(N, 2, S)
    fv_f = fv_height.reshape(N, C, S)
    ref_f = ref_seg.reshape(N, 1, S)
    if needs_mask:
        pad = ((0, 0), (0, 0), (0, S_pad - S))
        theta_f = jnp.pad(theta_f, pad)
        fv_f = jnp.pad(fv_f, pad)
        ref_f = jnp.pad(ref_f, pad)

    w1, b1, w2, b2, wd_fv, wd_nv, bd = params

    # Large-C decoder contraction goes to the MXU: pack the fv weights as an (8, C)
    # matrix in the stream dtype (row 0 real, rows 1..7 zero). Small C stays on VPU.
    use_mxu_fv = C >= 128
    if use_mxu_fv:
        wd_fv_arg = jnp.zeros((8, C), in_dtype).at[0, :].set(
            wd_fv[:, 0].astype(in_dtype))
    else:
        wd_fv_arg = wd_fv.astype(jnp.float32)

    # Grid: batch x spatial_outer x spatial_inner; the two leading axes are parallel
    # so the second v7x TensorCore has work even when N == 1.
    n_tiles = S_pad // ts
    so = 2 if (n_tiles >= 2 and n_tiles % 2 == 0) else 1
    si_tiles = n_tiles // so
    grid = (N, so, si_tiles)

    stream_spec = lambda c: pl.BlockSpec(
        (None, c, ts), lambda n, o, i: (n, 0, o * si_tiles + i))
    const_spec = lambda shape: pl.BlockSpec(shape, lambda n, o, i: (0,) * len(shape))

    # Per-generation VMEM limit from the real double-buffered requirement.
    vmem_limit = min(int(vmem_cap * 0.9), max(vmem_need + (8 << 20), 32 << 20))

    kernel = functools.partial(_silhouette_kernel,
                               use_mxu_fv=use_mxu_fv,
                               needs_mask=needs_mask,
                               s_valid=S)

    sig_flat, loss_part = pl.pallas_call(
        kernel,
        out_shape=(
            jax.ShapeDtypeStruct((N, 1, S_pad), out_dtype),       # sigmoid(xc), lane-dense
            jax.ShapeDtypeStruct((N, so, 1, ts), jnp.float32),    # BCE lane-partials
        ),
        grid_spec=pltpu.PrefetchScalarGridSpec(
            num_scalar_prefetch=0,
            grid=grid,
            in_specs=[
                stream_spec(2),                 # theta      (N,2,S_pad)
                stream_spec(C),                 # fv_height  (N,C,S_pad)
                stream_spec(1),                 # ref_seg    (N,1,S_pad)
                const_spec((32, 2)),            # w1
                const_spec((32, 1)),            # b1
                const_spec((32, 32)),           # w2
                const_spec((32, 1)),            # b2
                const_spec(wd_fv_arg.shape),    # wd_fv  ((8,C) MXU form or (C,1))
                const_spec((32, 1)),            # wd_nv
                const_spec((1, 1)),             # bd
            ],
            out_specs=[
                stream_spec(1),                                              # sigmoid
                pl.BlockSpec((None, None, 1, ts), lambda n, o, i: (n, o, 0, 0)),
            ],
        ),
        compiler_params=pltpu.CompilerParams(
            dimension_semantics=("parallel", "parallel", "arbitrary"),
            vmem_limit_bytes=int(vmem_limit)),
    )(theta_f, fv_f, ref_f, w1, b1, w2, b2, wd_fv_arg, wd_nv, bd)

    loss = jnp.sum(loss_part) / float(N * S)
    sig = sig_flat[:, :, :S].reshape(N, 1, H, W)
    return loss, sig


def _ref_forward(theta, fv_height, ref_seg, params):
    """Pure-JAX reference (mirrors the kernel's stream-dtype handling of wd_fv)."""
    w1, b1, w2, b2, wd_fv, wd_nv, bd = params
    N, _, H, W = theta.shape
    C = fv_height.shape[1]
    S = H * W
    t = theta.reshape(N, 2, S).astype(jnp.float32)
    h1 = jax.nn.relu(jnp.einsum("oc,ncs->nos", w1, t) + b1[None])
    nv = jax.nn.relu(jnp.einsum("oc,ncs->nos", w2, h1) + b2[None])
    fv = fv_height.reshape(N, C, S).astype(jnp.float32)
    wfv = wd_fv
    if C >= 128:  # kernel's MXU path holds the fv weights in the stream dtype
        wfv = wd_fv.astype(fv_height.dtype).astype(jnp.float32)
    xc = (jnp.sum(fv * wfv[None], axis=1, keepdims=True)
          + jnp.sum(nv * wd_nv[None], axis=1, keepdims=True)
          + bd[None])
    y = ref_seg.reshape(N, 1, S).astype(jnp.float32)
    loss = jnp.mean(jnp.maximum(xc, 0.0) - xc * y + jnp.log1p(jnp.exp(-jnp.abs(xc))))
    sig = jax.nn.sigmoid(xc).reshape(N, 1, H, W)
    return loss, sig


if __name__ == "__main__":
    key = jax.random.PRNGKey(0)

    # --- Test 1: f32 streams, small C (VPU contraction), multi-tile spatial split
    #     (exercises the outer-parallel axis and the inner-axis BCE accumulation). ---
    k_theta, k_fv, k_ref, k_par = jax.random.split(key, 4)
    N, C, H, W = 2, 64, 16, 32
    theta = jax.random.normal(k_theta, (N, 2, H, W), jnp.float32)
    fv_height = jax.random.normal(k_fv, (N, C, H, W), jnp.float32)
    ref_seg = (jax.random.uniform(k_ref, (N, 1, H, W)) > 0.5).astype(jnp.float32)
    params = init_params(k_par, C)

    loss, sig = silhouette_prediction(theta, fv_height, ref_seg, params,
                                      target_block_bytes=32 << 10)
    jax.block_until_ready((loss, sig))
    loss_ref, sig_ref = _ref_forward(theta, fv_height, ref_seg, params)
    assert jnp.allclose(loss, loss_ref, atol=1e-4, rtol=1e-4), (loss, loss_ref)
    assert jnp.allclose(sig, sig_ref, atol=1e-4, rtol=1e-4)

    # --- Test 2: bf16 streams, larger C (MXU contraction), non-aligned spatial size
    #     (exercises native-dtype streaming, bf16 sigmoid output, tail masking). ---
    k2 = jax.random.PRNGKey(1)
    k_theta2, k_fv2, k_ref2, k_par2 = jax.random.split(k2, 4)
    N2, C2, H2, W2 = 1, 256, 15, 17
    theta2 = jax.random.normal(k_theta2, (N2, 2, H2, W2), jnp.bfloat16)
    fv2 = jax.random.normal(k_fv2, (N2, C2, H2, W2), jnp.bfloat16)
    ref2 = (jax.random.uniform(k_ref2, (N2, 1, H2, W2)) > 0.5).astype(jnp.bfloat16)
    params2 = init_params(k_par2, C2)

    loss2, sig2 = silhouette_prediction(theta2, fv2, ref2, params2)
    jax.block_until_ready((loss2, sig2))
    loss2_ref, sig2_ref = _ref_forward(theta2, fv2, ref2, params2)
    assert sig2.dtype == jnp.bfloat16
    assert jnp.allclose(loss2, loss2_ref, atol=2e-3, rtol=2e-3), (loss2, loss2_ref)
    assert jnp.allclose(sig2.astype(jnp.float32), sig2_ref, atol=1e-2, rtol=1e-2)

    print("KERNEL_OK")
</pallas_src>

<mosaic_0001>
module attributes {stable_mosaic.version = 11 : i64} {
  func.func @_silhouette_kernel(%arg0: i32, %arg1: i32, %arg2: i32, %arg3: memref<1x2x128xf32, #tpu.memory_space<vmem>>, %arg4: memref<1x64x128xf32, #tpu.memory_space<vmem>>, %arg5: memref<1x1x128xf32, #tpu.memory_space<vmem>>, %arg6: memref<32x2xf32, #tpu.memory_space<vmem>>, %arg7: memref<32x1xf32, #tpu.memory_space<vmem>>, %arg8: memref<32x32xf32, #tpu.memory_space<vmem>>, %arg9: memref<32x1xf32, #tpu.memory_space<vmem>>, %arg10: memref<64x1xf32, #tpu.memory_space<vmem>>, %arg11: memref<32x1xf32, #tpu.memory_space<vmem>>, %arg12: memref<1x1xf32, #tpu.memory_space<vmem>>, %arg13: memref<1x1x128xf32, #tpu.memory_space<vmem>>, %arg14: memref<1x1x1x128xf32, #tpu.memory_space<vmem>>) attributes {dimension_semantics = [#tpu.dimension_semantics<parallel>, #tpu.dimension_semantics<parallel>, #tpu.dimension_semantics<arbitrary>], iteration_bounds = array<i64: 2, 2, 2>, scalar_prefetch = 0 : i64, scratch_operands = 0 : i64, tpu.core_type = #tpu.core_type<tc>, window_params = [{transform_indices = @transform_0, window_bounds = array<i64: 1, 2, 128>}, {transform_indices = @transform_1, window_bounds = array<i64: 1, 64, 128>}, {transform_indices = @transform_2, window_bounds = array<i64: 1, 1, 128>}, {pipeline_mode = #tpu.pipeline_mode<synchronous>, transform_indices = @transform_3, window_bounds = array<i64: 32, 2>}, {pipeline_mode = #tpu.pipeline_mode<synchronous>, transform_indices = @transform_4, window_bounds = array<i64: 32, 1>}, {pipeline_mode = #tpu.pipeline_mode<synchronous>, transform_indices = @transform_5, window_bounds = array<i64: 32, 32>}, {pipeline_mode = #tpu.pipeline_mode<synchronous>, transform_indices = @transform_6, window_bounds = array<i64: 32, 1>}, {pipeline_mode = #tpu.pipeline_mode<synchronous>, transform_indices = @transform_7, window_bounds = array<i64: 64, 1>}, {pipeline_mode = #tpu.pipeline_mode<synchronous>, transform_indices = @transform_8, window_bounds = array<i64: 32, 1>}, {pipeline_mode = #tpu.pipeline_mode<synchronous>, transform_indices = @transform_9, window_bounds = array<i64: 1, 1>}, {transform_indices = @transform_10, window_bounds = array<i64: 1, 1, 128>}, {transform_indices = @transform_11, window_bounds = array<i64: 1, 1, 1, 128>}]} {
    %c0_i32 = arith.constant 0 : i32
    %0 = arith.cmpi eq, %arg2, %c0_i32 : i32
    %1 = arith.extui %0 : i1 to i32
    %c0_i32_0 = arith.constant 0 : i32
    %2 = arith.cmpi ne, %1, %c0_i32_0 : i32
    scf.if %2 {
      %cst_44 = arith.constant 0.000000e+00 : f32
      %73 = vector.broadcast %cst_44 : f32 to vector<1x128xf32>
      %c0_45 = arith.constant 0 : index
      %c0_46 = arith.constant 0 : index
      %c0_47 = arith.constant 0 : index
      %c0_48 = arith.constant 0 : index
      %74 = vector.load %arg14[%c0_45, %c0_46, %c0_47, %c0_48] : memref<1x1x1x128xf32, #tpu.memory_space<vmem>>, vector<1x1x1x128xf32>
      %75 = vector.shape_cast %74 : vector<1x1x1x128xf32> to vector<1x128xf32>
      %76 = vector.shape_cast %73 : vector<1x128xf32> to vector<1x1x1x128xf32>
      tpu.vector_store %arg14[%c0_45, %c0_46, %c0_47, %c0_48], %76 {strides = array<i32>} : memref<1x1x1x128xf32, #tpu.memory_space<vmem>>, vector<1x1x1x128xf32>,
    } else {
    }
    %c0 = arith.constant 0 : index
    %c0_1 = arith.constant 0 : index
    %c0_2 = arith.constant 0 : index
    %3 = vector.load %arg3[%c0, %c0_1, %c0_2] : memref<1x2x128xf32, #tpu.memory_space<vmem>>, vector<1x2x128xf32>
    %4 = vector.shape_cast %3 : vector<1x2x128xf32> to vector<2x128xf32>
    %c0_3 = arith.constant 0 : index
    %c0_4 = arith.constant 0 : index
    %5 = vector.load %arg6[%c0_3, %c0_4] : memref<32x2xf32, #tpu.memory_space<vmem>>, vector<32x1xf32>
    %6 = vector.extract_strided_slice %4 {offsets = [0, 0], sizes = [1, 128], strides = [1, 1]} : vector<2x128xf32> to vector<1x128xf32>
    %7 = vector.broadcast %5 : vector<32x1xf32> to vector<32x128xf32>
    %8 = vector.broadcast %6 : vector<1x128xf32> to vector<32x128xf32>
    %9 = arith.mulf %7, %8 : vector<32x128xf32>
    %c0_5 = arith.constant 0 : index
    %c1 = arith.constant 1 : index
    %10 = vector.load %arg6[%c0_5, %c1] : memref<32x2xf32, #tpu.memory_space<vmem>>, vector<32x1xf32>
    %11 = vector.extract_strided_slice %4 {offsets = [1, 0], sizes = [1, 128], strides = [1, 1]} : vector<2x128xf32> to vector<1x128xf32>
    %12 = vector.broadcast %10 : vector<32x1xf32> to vector<32x128xf32>
    %13 = vector.broadcast %11 : vector<1x128xf32> to vector<32x128xf32>
    %14 = arith.mulf %12, %13 : vector<32x128xf32>
    %15 = arith.addf %9, %14 : vector<32x128xf32>
    %c0_6 = arith.constant 0 : index
    %c0_7 = arith.constant 0 : index
    %16 = vector.load %arg7[%c0_6, %c0_7] : memref<32x1xf32, #tpu.memory_space<vmem>>, vector<32x1xf32>
    %17 = vector.broadcast %16 : vector<32x1xf32> to vector<32x128xf32>
    %18 = arith.addf %15, %17 : vector<32x128xf32>
    %cst = arith.constant 0.000000e+00 : f32
    %19 = vector.broadcast %cst : f32 to vector<32x128xf32>
    %20 = arith.maximumf %18, %19 : vector<32x128xf32>
    %c0_8 = arith.constant 0 : index
    %c0_9 = arith.constant 0 : index
    %21 = vector.load %arg8[%c0_8, %c0_9] : memref<32x32xf32, #tpu.memory_space<vmem>>, vector<32x32xf32>
    %cst_10 = arith.constant dense<0.000000e+00> : vector<32x128xf32>
    %22 = tpu.matmul %21, %20, %cst_10 {dimension_numbers = #tpu.dot_dimension_numbers<[1], [0], [0], [1], [0, 0, 1, 1], [], []>} : vector<32x32xf32>, vector<32x128xf32>, vector<32x128xf32> -> vector<32x128xf32>
    %c0_11 = arith.constant 0 : index
    %c0_12 = arith.constant 0 : index
    %23 = vector.load %arg9[%c0_11, %c0_12] : memref<32x1xf32, #tpu.memory_space<vmem>>, vector<32x1xf32>
    %24 = vector.broadcast %23 : vector<32x1xf32> to vector<32x128xf32>
    %25 = arith.addf %22, %24 : vector<32x128xf32>
    %cst_13 = arith.constant 0.000000e+00 : f32
    %26 = vector.broadcast %cst_13 : f32 to vector<32x128xf32>
    %27 = arith.maximumf %25, %26 : vector<32x128xf32>
    %c0_14 = arith.constant 0 : index
    %c0_15 = arith.constant 0 : index
    %c0_16 = arith.constant 0 : index
    %28 = vector.load %arg4[%c0_14, %c0_15, %c0_16] : memref<1x64x128xf32, #tpu.memory_space<vmem>>, vector<1x64x128xf32>
    %29 = vector.shape_cast %28 : vector<1x64x128xf32> to vector<64x128xf32>
    %c0_17 = arith.constant 0 : index
    %c0_18 = arith.constant 0 : index
    %30 = vector.load %arg10[%c0_17, %c0_18] : memref<64x1xf32, #tpu.memory_space<vmem>>, vector<64x1xf32>
    %31 = vector.broadcast %30 : vector<64x1xf32> to vector<64x128xf32>
    %32 = arith.mulf %29, %31 : vector<64x128xf32>
    %cst_19 = arith.constant dense<0.000000e+00> : vector<128xf32>
    %33 = vector.multi_reduction <add>, %32, %cst_19 [0] : vector<64x128xf32> to vector<128xf32>
    %34 = vector.shape_cast %33 : vector<128xf32> to vector<1x128xf32>
    %c0_20 = arith.constant 0 : index
    %c0_21 = arith.constant 0 : index
    %35 = vector.load %arg11[%c0_20, %c0_21] : memref<32x1xf32, #tpu.memory_space<vmem>>, vector<32x1xf32>
    %36 = vector.broadcast %35 : vector<32x1xf32> to vector<32x128xf32>
    %37 = arith.mulf %27, %36 : vector<32x128xf32>
    %cst_22 = arith.constant dense<0.000000e+00> : vector<128xf32>
    %38 = vector.multi_reduction <add>, %37, %cst_22 [0] : vector<32x128xf32> to vector<128xf32>
    %39 = vector.shape_cast %38 : vector<128xf32> to vector<1x128xf32>
    %40 = arith.addf %34, %39 : vector<1x128xf32>
    %c0_23 = arith.constant 0 : index
    %c0_24 = arith.constant 0 : index
    %41 = vector.load %arg12[%c0_23, %c0_24] : memref<1x1xf32, #tpu.memory_space<vmem>>, vector<1x1xf32>
    %42 = vector.broadcast %41 : vector<1x1xf32> to vector<1x128xf32>
    %43 = arith.addf %40, %42 : vector<1x128xf32>
    %c0_25 = arith.constant 0 : index
    %c0_26 = arith.constant 0 : index
    %c0_27 = arith.constant 0 : index
    %44 = vector.load %arg5[%c0_25, %c0_26, %c0_27] : memref<1x1x128xf32, #tpu.memory_space<vmem>>, vector<1x1x128xf32>
    %45 = vector.shape_cast %44 : vector<1x1x128xf32> to vector<1x128xf32>
    %46 = math.absf %43 : vector<1x128xf32>
    %cst_28 = arith.constant 0.000000e+00 : f32
    %47 = vector.broadcast %cst_28 : f32 to vector<1x128xf32>
    %48 = arith.subf %47, %46 : vector<1x128xf32>
    %49 = math.exp %48 : vector<1x128xf32>
    %cst_29 = arith.constant 0.000000e+00 : f32
    %50 = vector.broadcast %cst_29 : f32 to vector<1x128xf32>
    %51 = arith.maximumf %43, %50 : vector<1x128xf32>
    %52 = arith.mulf %43, %45 : vector<1x128xf32>
    %53 = arith.subf %51, %52 : vector<1x128xf32>
    %54 = math.log1p %49 : vector<1x128xf32>
    %55 = arith.addf %53, %54 : vector<1x128xf32>
    %c0_30 = arith.constant 0 : index
    %c0_31 = arith.constant 0 : index
    %c0_32 = arith.constant 0 : index
    %c0_33 = arith.constant 0 : index
    %56 = vector.load %arg14[%c0_30, %c0_31, %c0_32, %c0_33] : memref<1x1x1x128xf32, #tpu.memory_space<vmem>>, vector<1x1x1x128xf32>
    %57 = vector.shape_cast %56 : vector<1x1x1x128xf32> to vector<1x128xf32>
    %58 = arith.addf %57, %55 : vector<1x128xf32>
    %c0_34 = arith.constant 0 : index
    %c0_35 = arith.constant 0 : index
    %c0_36 = arith.constant 0 : index
    %c0_37 = arith.constant 0 : index
    %59 = vector.load %arg14[%c0_34, %c0_35, %c0_36, %c0_37] : memref<1x1x1x128xf32, #tpu.memory_space<vmem>>, vector<1x1x1x128xf32>
    %60 = vector.shape_cast %59 : vector<1x1x1x128xf32> to vector<1x128xf32>
    %61 = vector.shape_cast %58 : vector<1x128xf32> to vector<1x1x1x128xf32>
    tpu.vector_store %arg14[%c0_34, %c0_35, %c0_36, %c0_37], %61 {strides = array<i32>} : memref<1x1x1x128xf32, #tpu.memory_space<vmem>>, vector<1x1x1x128xf32>,
    %cst_38 = arith.constant 1.000000e+00 : f32
    %62 = vector.broadcast %cst_38 : f32 to vector<1x128xf32>
    %63 = arith.addf %62, %49 : vector<1x128xf32>
    %cst_39 = arith.constant 1.000000e+00 : f32
    %64 = vector.broadcast %cst_39 : f32 to vector<1x128xf32>
    %65 = arith.divf %64, %63 : vector<1x128xf32>
    %cst_40 = arith.constant 0.000000e+00 : f32
    %66 = vector.broadcast %cst_40 : f32 to vector<1x128xf32>
    %67 = arith.cmpf oge, %43, %66 : vector<1x128xf32>
    %68 = arith.mulf %49, %65 : vector<1x128xf32>
    %69 = arith.select %67, %65, %68 : vector<1x128xi1>, vector<1x128xf32>
    %c0_41 = arith.constant 0 : index
    %c0_42 = arith.constant 0 : index
    %c0_43 = arith.constant 0 : index
    %70 = vector.load %arg13[%c0_41, %c0_42, %c0_43] : memref<1x1x128xf32, #tpu.memory_space<vmem>>, vector<1x1x128xf32>
    %71 = vector.shape_cast %70 : vector<1x1x128xf32> to vector<1x128xf32>
    %72 = vector.shape_cast %69 : vector<1x128xf32> to vector<1x1x128xf32>
    tpu.vector_store %arg13[%c0_41, %c0_42, %c0_43], %72 {strides = array<i32>} : memref<1x1x128xf32, #tpu.memory_space<vmem>>, vector<1x1x128xf32>,
    return
  }
  func.func @transform_0(%arg0: i32, %arg1: i32, %arg2: i32) -> (i32, i32, i32) {
    %c2_i32 = arith.constant 2 : i32
    %0 = arith.muli %arg1, %c2_i32 : i32
    %1 = arith.addi %0, %arg2 : i32
    %c0_i32 = arith.constant 0 : i32
    %c0_i32_0 = arith.constant 0 : i32
    return %arg0, %c0_i32, %1 : i32, i32, i32
  }
  func.func @transform_1(%arg0: i32, %arg1: i32, %arg2: i32) -> (i32, i32, i32) {
    %c2_i32 = arith.constant 2 : i32
    %0 = arith.muli %arg1, %c2_i32 : i32
    %1 = arith.addi %0, %arg2 : i32
    %c0_i32 = arith.constant 0 : i32
    %c0_i32_0 = arith.constant 0 : i32
    return %arg0, %c0_i32, %1 : i32, i32, i32
  }
  func.func @transform_2(%arg0: i32, %arg1: i32, %arg2: i32) -> (i32, i32, i32) {
    %c2_i32 = arith.constant 2 : i32
    %0 = arith.muli %arg1, %c2_i32 : i32
    %1 = arith.addi %0, %arg2 : i32
    %c0_i32 = arith.constant 0 : i32
    %c0_i32_0 = arith.constant 0 : i32
    return %arg0, %c0_i32, %1 : i32, i32, i32
  }
  func.func @transform_3(%arg0: i32, %arg1: i32, %arg2: i32) -> (i32, i32) {
    %c0_i32 = arith.constant 0 : i32
    %c0_i32_0 = arith.constant 0 : i32
    %c0_i32_1 = arith.constant 0 : i32
    return %c0_i32, %c0_i32_0 : i32, i32
  }
  func.func @transform_4(%arg0: i32, %arg1: i32, %arg2: i32) -> (i32, i32) {
    %c0_i32 = arith.constant 0 : i32
    %c0_i32_0 = arith.constant 0 : i32
    %c0_i32_1 = arith.constant 0 : i32
    return %c0_i32, %c0_i32_0 : i32, i32
  }
  func.func @transform_5(%arg0: i32, %arg1: i32, %arg2: i32) -> (i32, i32) {
    %c0_i32 = arith.constant 0 : i32
    %c0_i32_0 = arith.constant 0 : i32
    %c0_i32_1 = arith.constant 0 : i32
    return %c0_i32, %c0_i32_0 : i32, i32
  }
  func.func @transform_6(%arg0: i32, %arg1: i32, %arg2: i32) -> (i32, i32) {
    %c0_i32 = arith.constant 0 : i32
    %c0_i32_0 = arith.constant 0 : i32
    %c0_i32_1 = arith.constant 0 : i32
    return %c0_i32, %c0_i32_0 : i32, i32
  }
  func.func @transform_7(%arg0: i32, %arg1: i32, %arg2: i32) -> (i32, i32) {
    %c0_i32 = arith.constant 0 : i32
    %c0_i32_0 = arith.constant 0 : i32
    %c0_i32_1 = arith.constant 0 : i32
    return %c0_i32, %c0_i32_0 : i32, i32
  }
  func.func @transform_8(%arg0: i32, %arg1: i32, %arg2: i32) -> (i32, i32) {
    %c0_i32 = arith.constant 0 : i32
    %c0_i32_0 = arith.constant 0 : i32
    %c0_i32_1 = arith.constant 0 : i32
    return %c0_i32, %c0_i32_0 : i32, i32
  }
  func.func @transform_9(%arg0: i32, %arg1: i32, %arg2: i32) -> (i32, i32) {
    %c0_i32 = arith.constant 0 : i32
    %c0_i32_0 = arith.constant 0 : i32
    %c0_i32_1 = arith.constant 0 : i32
    return %c0_i32, %c0_i32_0 : i32, i32
  }
  func.func @transform_10(%arg0: i32, %arg1: i32, %arg2: i32) -> (i32, i32, i32) {
    %c2_i32 = arith.constant 2 : i32
    %0 = arith.muli %arg1, %c2_i32 : i32
    %1 = arith.addi %0, %arg2 : i32
    %c0_i32 = arith.constant 0 : i32
    %c0_i32_0 = arith.constant 0 : i32
    return %arg0, %c0_i32, %1 : i32, i32, i32
  }
  func.func @transform_11(%arg0: i32, %arg1: i32, %arg2: i32) -> (i32, i32, i32, i32) {
    %c0_i32 = arith.constant 0 : i32
    %c0_i32_0 = arith.constant 0 : i32
    %c0_i32_1 = arith.constant 0 : i32
    return %arg0, %arg1, %c0_i32, %c0_i32_0 : i32, i32, i32, i32
  }
}

</mosaic_0001>

<bundles_post_ra>
// kernel: tpu_custom_call.1
= control target key start
LH: loop header
LB: loop body
LE: loop exit
PB: predicated region body
PF: predicated region fallthrough
CT: control target
= control target key end

     0   :  { %s2088_s0 = inlined_call_operand.vmem [shape: f32[2,2,512], index: 0, kind: input, shape index: {}]   ;;  %s2089_s1 = inlined_call_operand.hbm [shape: f32[2,64,512], index: 1, kind: input, shape index: {}]   ;;  %s2090_s2 = inlined_call_operand.vmem [shape: f32[2,1,512], index: 2, kind: input, shape index: {}]   ;;  %s2091_s3 = inlined_call_operand.vmem [shape: f32[32,2], index: 3, kind: input, shape index: {}]   ;;  %s2092_s4 = inlined_call_operand.vmem [shape: f32[32,1], index: 4, kind: input, shape index: {}]   ;;  %s2093_s5 = inlined_call_operand.vmem [shape: f32[32,32], index: 5, kind: input, shape index: {}]   ;;  %s2094_s6 = inlined_call_operand.vmem [shape: f32[32,1], index: 6, kind: input, shape index: {}]   ;;  %s2095_s7 = inlined_call_operand.vmem [shape: f32[64,1], index: 7, kind: input, shape index: {}]   ;;  %s2096_s8 = inlined_call_operand.vmem [shape: f32[32,1], index: 8, kind: input, shape index: {}]   ;;  %s2097_s9 = inlined_call_operand.<no memory space> [shape: f32[1,1], index: 9, kind: input, shape index: {}]   ;;  %s2098_s10 = inlined_call_operand.hbm [shape: f32[2,1,512], index: 10, kind: output, shape index: {0}]   ;;  %s2099_s11 = inlined_call_operand.hbm [shape: f32[2,2,1,128], index: 11, kind: output, shape index: {1}]  }
   0x1   :  { %2121 = sst [smem:[#allocation22_spill]] %s2088_s0  ;;  %v17_v0 = vstv %s2097_s9 }
   0x2   :  { %2122 = sst [smem:[#allocation23_spill]] %s2089_s1  ;;  %18 = vst [vmem:[#allocation2] sm:$0x1] %v17_v0 }
   0x3   :  { %2123 = sst [smem:[#allocation24_spill]] %s2091_s3 }
   0x4   :  { %2124 = sst [smem:[#allocation25_spill]] %s2092_s4 }
   0x5   :  { %2125 = sst [smem:[#allocation26_spill]] %s2093_s5 }
   0x6   :  { %2126 = sst [smem:[#allocation27_spill]] %s2094_s6 }
   0x7   :  { %2127 = sst [smem:[#allocation28_spill]] %s2095_s7 }
   0x8   :  { %2128 = sst [smem:[#allocation29_spill]] %s2096_s8 }
   0x9   :  { %2129 = sst [smem:[#allocation30_spill]] %s2098_s10 }
   0xa   :  { %2130 = sst [smem:[#allocation31_spill]] %s2099_s11 }
   0xb   :  { %19 = vsyncpa [#allocation4], 0 }
   0xc   :  { %21 = vsyncpa [#allocation4 + $0x1], 0 }
   0xd   :  { %22 = vsyncpa [#allocation5], 0 }
   0xe   :  { %24 = vsyncpa [#allocation5 + $0x1], 0 }
   0xf   :  { %25 = vsyncpa [#allocation8], 0 }
  0x10   :  { %27 = vsyncpa [#allocation8 + $0x1], 0  ;;  %s1599_s19 = smov 0   ;;  %s1601_s20 = smov 0  }
  0x11   :  { %s1603_s21 = smov 0   ;;  %s1605_s22 = smov 0  }
  0x12   :  { %s1607_s23 = smov 0   ;;  %s1609_s24 = smov 0  }
  0x13   :  { %s1611_s9 = smov 0   ;;  %s1613_s25 = smov 0  }
  0x14   :  { %s1615_s26 = smov 0   ;;  %s1617_s27 = smov 0  }
  0x15   :  { %s1619_s28 = smov 0   ;;  %s1621_s29 = smov 0  }
  0x16   :  { %s1623_s30 = smov 0  }
  0x17 LB: > { %2131 = sst [smem:[#allocation12_spill]] %s1477_s19  ;;  %s1115_s12 = sadd.s32 4294967295, %s1525_s30   ;;  %s1525_s30 = sphi %s1623_s30, %s33_s30   ;;  %s1521_s29 = sphi %s1621_s29, %s2184_s29   ;;  %s1517_s28 = sphi %s1619_s28, %s2191_s28   ;;  %s1513_s27 = sphi %s1617_s27, %s2182_s27   ;;  %s1509_s26 = sphi %s1615_s26, %s2181_s26   ;;  %s1505_s25 = sphi %s1613_s25, %s2180_s25   ;;  %s1501_s9 = sphi %s1611_s9, %s2179_s9   ;;  %s1497_s24 = sphi %s1609_s24, %s2178_s24   ;;  %s1493_s23 = sphi %s1607_s23, %s2190_s23   ;;  %s1489_s22 = sphi %s1605_s22, %s2189_s22   ;;  %s1485_s21 = sphi %s1603_s21, %s2188_s21   ;;  %s1481_s20 = sphi %s1601_s20, %s2187_s20   ;;  %s1477_s19 = sphi %s1599_s19, %s2186_s19  }
  0x18   : > { %2132 = sst [smem:[#allocation13_spill]] %s1497_s24  ;;  %s1116_s13 = sadd.s32 4294967294, %s1525_s30  }
  0x19   : > { %2133 = sst [smem:[#allocation14_spill]] %s1513_s27  ;;  %s45_s14 = sadd.s32 1, %s1513_s27 }
  0x1a   : > { %2134 = sst [smem:[#allocation15_spill]] %s1517_s28  ;;  %s48_s15 = sadd.s32 1, %s1517_s28 }
  0x1b   : > { %2135 = sst [smem:[#allocation16_spill]] %s1521_s29  ;;  %p46_p0 = scmp.ge.s32.totalorder %s45_s14, 2 }
  0x1c   : > { %s52_s16 = sadd.s32 1, %s1521_s29  ;;  %s1119_s17 = sshll.u32 %s1517_s28, 1 }
  0x1d   : > { %s97_s18 = sadd.s32 1, %s1497_s24  ;;  %s2193_s14 = smov (%p46_p0, %s45_s14), 0 }
  0x1e   : > { %2136 = sst [smem:[#allocation17_spill]] %s2193_s14  ;;  %s2195_s15 = smov (!%p46_p0, %s48_s15), %s1517_s28 }
  0x1f   : > { %s1675_s11 = sadd.s32 %s1513_s27, %s1119_s17  ;;  %p104_p1 = scmp.ne.s32.totalorder %s1497_s24, %s1493_s23 }
  0x20   : > { %p50_p2 = scmp.ge.s32.totalorder %s2195_s15, 2  ;;  %p105_p3 = scmp.eq.s32.totalorder %s1525_s30, 0 }
  0x21   : > { %p110_p4 = scmp.ne.s32.totalorder %s1493_s23, %s1489_s22  ;;  %p111_p5 = scmp.eq.s32.totalorder %s1115_s12, 0 }
  0x22   : > { %s2197_s15 = smov (%p50_p2, %s2195_s15), 0  ;;  %s2199_s16 = smov (!%p50_p2, %s52_s16), %s1521_s29 }
  0x23   : > { %2137 = sst [smem:[#allocation18_spill]] %s2197_s15  ;;  %s1120_s10 = sshll.u32 %s2197_s15, 1 }
  0x24   : > { %p1689_p6 = por %p105_p3, %p104_p1  ;;  %p54_p7 = scmp.ge.s32.totalorder %s2199_s16, 2 }
  0x25   : > { %s91_s27 = sadd.s32 %s1120_s10, %s2193_s14  ;;  %p1698_p8 = por %p111_p5, %p110_p4 }
  0x26   : > { %s93_s8 = ssub.s32 %s1675_s11, %s91_s27  ;;  %s2201_s16 = smov (%p54_p7, %s2199_s16), 0 }
  0x27   : > { %2140 = sst [smem:[#allocation19_spill]] %s2201_s16  ;;  %p1704_p9 = scmp.eq.s32.totalorder %s1115_s12, 7 }
  0x28   : > { %p1708_p10 = scmp.eq.s32.totalorder %s1116_s13, 7  ;;  %s92_s27 = ssub.s32 %s1521_s29, %s2201_s16 }
  0x29   : > { %s332_s14 = ssub.s32 %s1517_s28, %s2197_s15  ;;  %s94_s7 = sor.u32 %s93_s8, %s92_s27 }
  0x2a   : > { %p1721_p11 = por %p1704_p9, %p104_p1  ;;  %p95_p12 = scmp.eq.s32.totalorder %s94_s7, 0 }
  0x2b   : > { %p1730_p13 = por %p1708_p10, %p110_p4  ;;  %s333_s4 = sor.u32 %s332_s14, %s92_s27 }
  0x2c   : > { %s2143_s12 = scalar_select %p1721_p11, 1, 0 }
  0x2d   : > { %s2144_s13 = scalar_select %p1730_p13, 1, 0 }
  0x2e   : > { %s336_s16 = sadd.s32 1, %s1485_s21  ;;  %p334_p0 = scmp.eq.s32.totalorder %s333_s4, 0 }
  0x2f   : > { %s1736_s3 = scalar_select %p95_p12, %s1497_s24, %s97_s18  }
  0x30   : > { %p346_p2 = scmp.ne.s32.totalorder %s1485_s21, %s1481_s20  ;;  %p352_p3 = scmp.ne.s32.totalorder %s1481_s20, %s1477_s19 }
  0x31   : > { %2145 = sst [smem:[#allocation20_spill]] %s1736_s3  ;;  %p1201_p5 = scmp.lt.s32.totalorder %s1525_s30, 8 }
  0x32   : > { %s1743_s8 = scalar_select %p334_p0, %s1485_s21, %s336_s16  }
  0x33   : > { %p1747_p1 = por %p346_p2, %p1704_p9  ;;  %p1753_p4 = por %p352_p3, %p1708_p10 }
  0x34   : > { %2146 = sst [smem:[#allocation21_spill]] %s1743_s8  ;;  %s409_s14 = sand.u32 1, %s1497_s24  }
  0x35   : > { %s2147_s15 = scalar_select %p1747_p1, 1, 0 }
  0x36   : > { %s2148_s7 = scalar_select %p1753_p4, 1, 0 }
  0x37   : > { %s1127_s18 = sshll.u32 %s409_s14, 6  ;;  %s1129_s27 = sshll.u32 %s1521_s29, 5 }
  0x38   : > { %s420_s4 = sadd.s32 %s1129_s27, %s1675_s11  ;;  %s413_s28 = scalar_lea.vmem [#allocation3], %s1127_s18 }
  0x39   : > { %s423_s3 = sshll.u32 %s413_s28, 4  ;;  %s1130_s19 = sshll.u32 %s420_s4, 7  ;;  %s1761_s3 = int_to_ptr.vmem [resolvable:$true] %s423_s3 }
  0x3a   : > { %s2149_s1 = sld [smem:[#allocation23_spill]]  ;;  %p1770_p7 = pnand %p1201_p5, %p1689_p6 }
  0x3b   : > { %s1774_s11 = scalar_lea.sflag [#allocation4], %s409_s14 }
  0x3c   : > { %p1327_p10 = pneg %p1770_p7 }
  0x40   : > { %s1766_s8 = scalar_lea.hbm %s2149_s1, %s1130_s19  ;;  %s1330_s18 = scalar_lea.hbm %s2149_s1, 8192 }
  0x41   : > { %s1325_s28 = scalar_lea.hbm %s1766_s8, 1024  ;;  %p1331_p6 = scmp.lt.u32.totalorder %s1766_s8, %s2149_s1 }
  0x42   : > { %p1326_p9 = scmp.ne.s32.totalorder %s1766_s8, %s1325_s28  ;;  %p1332_p2 = scmp.lt.u32.totalorder %s1330_s18, %s1325_s28 }
  0x43   : > { %p1334_p5 = scmp.lt.u32.totalorder %s1325_s28, %s1766_s8 }
  0x44   : > { %p1328_p12 = pnand %p1327_p10, %p1326_p9  ;;  %p1333_p3 = por %p1332_p2, %p1331_p6 }
  0x46   : > { %p1329_p0 = pneg %p1328_p12  ;;  %p1335_p4 = por %p1334_p5, %p1333_p3 }
  0x48   : > { %p1336_p13 = pnand %p1335_p4, %p1329_p0 }
  0x4a   : > { %1339 = shalt.err (!%p1336_p13)
}
  0x4b   : > { %s1340_s14 = scalar_lea.vmem %s1761_s3, 1024  ;;  %s1527_s6 = smov [#allocation3]  }
  0x4c   : > { %p1341_p9 = scmp.ne.s32.totalorder %s1761_s3, %s1340_s14  ;;  %s1345_s16 = sshll.u32 %s1527_s6, 4  ;;  %s1346_s16 = int_to_ptr.vmem [resolvable:$false] %s1345_s16 }
  0x4d   : > { %s1347_s19 = scalar_lea.vmem %s1346_s16, 2048  ;;  %p1348_p11 = scmp.lt.s32.totalorder %s1761_s3, %s1346_s16 }
  0x4e   : > { %p1343_p12 = pnand %p1341_p9, %p1327_p10  ;;  %p1349_p6 = scmp.lt.s32.totalorder %s1347_s19, %s1340_s14 }
  0x50   : > { %p1344_p1 = pneg %p1343_p12  ;;  %p1350_p2 = por %p1349_p6, %p1348_p11 }
  0x52   : > { %p1351_p3 = pnand %p1350_p2, %p1344_p1 }
  0x54   : > { %1354 = shalt.err (!%p1351_p3)
}
  0x55   : > { %s1528_s28 = smov 512   ;;  %s1529_s17 = smov 128  }
  0x56   : > { %s1530_s18 = smov 8   ;;  %p1131_p13 = scmp.ge.s32.totalorder %s1525_s30, 1 }
  0x57   : > { %1193 = dma.hbm_to_vmem [thread:$0]  (!%p1770_p7), %s1766_s8, 1024, %s1761_s3, %s1774_s11, %s1528_s28, %s1529_s17, %s1530_s18  }
  0x58   : > { %p445_p4 = scmp.lt.s32.totalorder %s1525_s30, 9 }
  0x5a   : > { %p446_p10 = pnand %p1131_p13, %p445_p4 }
  0x5b   : > { %s1805_s27 = sand.u32 (!%p446_p10), 1, %s1493_s23  }
  0x5c   : > { %449 = sbr.rel (%p446_p10) target bundleno = 602 (0x25a), region = 60  ;;  %s1132_s4 = sshll.u32 (!%p446_p10), %s1805_s27, 6 }
  0x5d   : > { %s452_s14 = scalar_lea.sflag (!%p446_p10), [#allocation4], %s1805_s27  ;;  %s1809_s6 = scalar_lea.vmem (!%p446_p10), [#allocation3], %s1132_s4 }
  0x63   : > { %1464 = dma.done.wait (%p1698_p8), %s452_s14, 1024  }
  0x64   : > { %1466 = vsyncadd (%p1698_p8), %s452_s14, 4294966272  ;;  %s1133_s8 = sshll.u32 %s1505_s25, 1  ;;  %p518_p11 = scmp.lt.s32.totalorder %s1509_s26, 1 }
  0x65   : > { %s1818_s10 = sadd.s32 %s1501_s9, %s1133_s8  ;;  %s2151_s0 = sld [smem:[#allocation22_spill]] }
  0x66   : > { %p520_p1 = scmp.lt.s32.totalorder %s1818_s10, 3  ;;  %s2152_s29 = sand.u32 1, %s1481_s20  }
  0x67   : > { %s519_s11 = scalar_select %p518_p11, %s1509_s26, 1 }
  0x68   : > { %s521_s16 = scalar_select %p520_p1, %s1818_s10, 3 }
  0x69   : > { %s1134_s19 = sshll.u32 %s519_s11, 2  ;;  %s1839_s24 = scalar_lea.vmem [#allocation7], %s2152_s29 }
  0x6a   : > { %s1824_s5 = sadd.s32 %s1134_s19, %s521_s16  ;;  %p1138_p8 = scmp.ne.s32.totalorder %s1501_s9, 0 }
  0x6b   : > { %s1135_s28 = sshll.u32 %s1824_s5, 1  ;;  %v1531_v1 = vmov (!%p1138_p8), 0.0  }
  0x6c   : > { %s1834_s8 = scalar_lea.vmem %s2151_s0, %s1135_s28  ;;  %546 = sbr.rel (%p1138_p8) target bundleno = 115 (0x73), region = 68  ;;  %547 = vst [vmem:[%s1839_s24] sm:$0x1] (!%p1138_p8), %v1531_v1 }
  0x73 PF: > { %s2153_s19 = sld [smem:[#allocation24_spill]]  ;;  %v1532_v4 = vmov 1   ;;  %v1533_v6 = vmov 0   ;;  %s2155_s11 = sld [smem:[#allocation25_spill]]  ;;  %vm669_vm0 = vcmask 261120   ;;  %v573_v31 = vlaneseq }
  0x74   : > { %1315 = vset.pattern.permute.xlu0 %v1532_v4  ;;  %1313 = vset.pattern.permute.xlu1 %v1532_v4  ;;  %s2156_s9 = sld [smem:[#allocation28_spill]]  ;;  %s2158_s18 = sld [smem:[#allocation27_spill]]  ;;  %v886_v28 = vld [vmem:[#allocation2] sm:$0x1] }
  0x75   : > { %s2160_s4 = sld [smem:[#allocation29_spill]]  ;;  %v1923_v34 = vshrl.u32 %v573_v31, 7  ;;  %v548_v39 = vld [vmem:[%s1834_s8] sm:$0x3]  ;;  %s2161_s14 = scalar_lea.vmem %s2090_s2, %s1824_s5 }
  0x76   : > { %s1146_s16 = sshll.u32 %s1509_s26, 1  ;;  %s2162_s29 = scalar_lea.vmem [#allocation6], %s1805_s27 }
  0x77   : > { %v575_v37 = vsub.s32 0, %v1923_v34  ;;  %v599_v38 = vsub.s32 1, %v1923_v34  ;;  %v897_v34 = vld [vmem:[%s2161_s14] sm:$0x1]  ;;  %s946_s8 = sshll.u32 %s2162_s29, 4  ;;  %s926_s0 = scalar_lea.sflag [#allocation5], %s1805_s27  ;;  %s1966_s8 = int_to_ptr.vmem [resolvable:$true] %s946_s8 }
  0x78   : > { %p2168_p0 = scmp.ne.s32.totalorder %s2143_s12, 0  ;;  %s1534_s14 = smov [#allocation6]  }
  0x79   : > { %s2154_s17 = smov %s2153_s19  ;;  %v551_v2 = vld [vmem:[%s2153_s19 + $0x10] sm:$0xff]  ;;  %v610_v8 = vld [vmem:[%s2155_s11 + $0x8] sm:$0xff]  ;;  %v609_v9 = vld [vmem:[%s2155_s11] sm:$0xff]  ;;  %v576_v42 = vrot.slane %v548_v39, %v575_v37  ;;  %v600_v43 = vrot.slane %v548_v39, %v599_v38 }
  0x7a   : > { %v549_v3 = vld [vmem:[%s2154_s17] sm:$0xff]  ;;  %590 = vperm.xlu0 %1315, %v551_v2   ;;  %v550_v5 = vld [vmem:[%s2154_s17 + $0x8] sm:$0xff]  ;;  %v552_v7 = vld [vmem:[%s2154_s17 + $0x18] sm:$0xff]  ;;  %s2157_s3 = smov %s2156_s9  ;;  %s1355_s17 = scalar_lea.vmem %s1966_s8, 16 }
  0x7b   : > { %582 = vperm.xlu1 %1313, %v549_v3   ;;  %v779_v10 = vld [vmem:[%s2156_s9] sm:$0xff]  ;;  %v611_v11 = vld [vmem:[%s2155_s11 + $0x10] sm:$0xff]  ;;  %v612_v13 = vld [vmem:[%s2155_s11 + $0x18] sm:$0xff]  ;;  %s2159_s11 = sld [smem:[#allocation26_spill]]  ;;  %p1356_p7 = scmp.ne.s32.totalorder %s1966_s8, %s1355_s17 }
  0x7c   : > { %v781_v12 = vld [vmem:[%s2157_s3 + $0x10] sm:$0xff]  ;;  %v646_v14 = vld [vmem:[%s2158_s18 + $0x8] sm:$0xff]  ;;  %v645_v17 = vld [vmem:[%s2158_s18] sm:$0xff] }
  0x7d   : > { %v780_v15 = vld [vmem:[%s2157_s3 + $0x8] sm:$0xff]  ;;  %v647_v16 = vld [vmem:[%s2158_s18 + $0x10] sm:$0xff]  ;;  %v648_v18 = vld [vmem:[%s2158_s18 + $0x18] sm:$0xff]  ;;  %p1357_p5 = pnand %p1356_p7, %p2168_p0 }
  0x7e   : > { %1316 = vset.pattern.permute.xlu0 %v1533_v6  ;;  %v782_v21 = vld [vmem:[%s2157_s3 + $0x18] sm:$0xff]  ;;  %v848_v22 = vld [vmem:[%s2160_s4] sm:$0xff]  ;;  %v785_v24 = vld [vmem:[%s2157_s3 + $0x30] sm:$0xff] }
  0x7f   : > { %586 = vperm.xlu1 %1313, %v550_v5   ;;  %555 = vperm.xlu0 %1316, %v549_v3   ;;  %v783_v23 = vld [vmem:[%s2157_s3 + $0x20] sm:$0xff]  ;;  %v784_v25 = vld [vmem:[%s2157_s3 + $0x28] sm:$0xff]  ;;  %v786_v26 = vld [vmem:[%s2157_s3 + $0x38] sm:$0xff]  ;;  %p1358_p9 = pneg %p1357_p5 }
  0x80   : > { %v849_v27 = vld [vmem:[%s2160_s4 + $0x8] sm:$0xff]  ;;  %v850_v29 = vld [vmem:[%s2160_s4 + $0x10] sm:$0xff]  ;;  %v851_v30 = vld [vmem:[%s2160_s4 + $0x18] sm:$0xff] }
  0x81   : > { %v641_v19 = vld [vmem:[%s2159_s11] sm:$0xff]  ;;  %v643_v20 = vld [vmem:[%s2159_s11 + $0x10] sm:$0xff] }
  0x82   : > { %1166 = vmatprep.mubr.msk.f32.mxu0 %vm669_vm0, %v641_v19  ;;  %1169 = vmatprep.mubr.msk.f32.mxu1 %vm669_vm0, %v643_v20 }
  0x83   : > { %1314 = vset.pattern.permute.xlu1 %v1533_v6  ;;  %560 = vperm.xlu0 %1316, %v550_v5  }
  0x84   : > { %570 = vperm.xlu1 %1314, %v552_v7  }
  0x87   : > { %565 = vperm.xlu0 %1316, %v551_v2  }
  0x88   : > { %1317 = vset.pattern.permute.xlu1 %v1532_v4 }
  0x89   : > { %594 = vperm.xlu1 %1317, %v552_v7  }
  0x8b   : > { %620 = vperm.xlu0 %1316, %v610_v8   ;;  %v642_v8 = vld [vmem:[%s2159_s11 + $0x8] sm:$0xff] }
  0x8d   : > { %1318 = vset.pattern.permute.xlu1 %v1533_v6 }
  0x8e   : > { %615 = vperm.xlu1 %1318, %v609_v9   ;;  %v644_v9 = vld [vmem:[%s2159_s11 + $0x18] sm:$0xff] }
  0x8f   : > { %789 = vperm.xlu0 %1316, %v779_v10  }
  0x92   : > { %625 = vperm.xlu1 %1318, %v611_v11  }
  0x93   : > { %799 = vperm.xlu0 %1316, %v781_v12  }
  0x96   : > { %630 = vperm.xlu1 %1318, %v612_v13  }
  0x97   : > { %656 = vperm.xlu0 %1316, %v646_v14  }
  0x9a   : > { %794 = vperm.xlu1 %1318, %v780_v15  }
  0x9b   : > { %661 = vperm.xlu0 %1316, %v647_v16  }
  0x9e   : > { %651 = vperm.xlu1 %1318, %v645_v17   ;;  %v772_v17 = vld [vmem:[%s1809_s6 + $0x8] sm:$0xff] }
  0x9f   : > { %666 = vperm.xlu0 %1316, %v648_v18   ;;  %v771_v18 = vld [vmem:[%s1809_s6] sm:$0xff] }
  0xa2   : > { %804 = vperm.xlu1 %1318, %v782_v21  }
  0xa3   : > { %854 = vperm.xlu0 %1316, %v848_v22  }
  0xa6   : > { %809 = vperm.xlu1 %1318, %v783_v23   ;;  %v773_v23 = vld [vmem:[%s1809_s6 + $0x10] sm:$0xff] }
  0xa7   : > { %819 = vperm.xlu0 %1316, %v785_v24   ;;  %v774_v24 = vld [vmem:[%s1809_s6 + $0x18] sm:$0xff] }
  0xaa   : > { %814 = vperm.xlu1 %1318, %v784_v25  }
  0xab   : > { %824 = vperm.xlu0 %1316, %v786_v26  }
  0xae   : > { %859 = vperm.xlu1 %1318, %v849_v27   ;;  %v775_v27 = vld [vmem:[%s1809_s6 + $0x20] sm:$0xff] }
  0xaf   : > { %889 = vperm.xlu0 %1316, %v886_v28  }
  0xb2   : > { %864 = vperm.xlu1 %1318, %v850_v29  }
  0xb6   : > { %869 = vperm.xlu1 %1318, %v851_v30   ;;  %v776_v30 = vld [vmem:[%s1809_s6 + $0x28] sm:$0xff] }
  0xf9   : > { %v591_v33 = vpop.permute.xlu0 %590 }
  0xfa   : > { %v583_v32 = vpop.permute.xlu1 %582  ;;  %v603_v57 = vmul.f32 %v600_v43, %v591_v33 }
  0xfb   : > { %v601_v49 = vmul.f32 %v600_v43, %v583_v32 }
  0xfe   : > { %v587_v35 = vpop.permute.xlu1 %586  ;;  %v556_v36 = vpop.permute.xlu0 %555 }
  0xff   : > { %v602_v46 = vmul.f32 %v600_v43, %v587_v35  ;;  %v577_v47 = vmul.f32 %v576_v42, %v556_v36 }
 0x101   : > { %v605_v53 = vadd.f32 %v601_v49, %v577_v47 }
 0x102   : > { %v561_v40 = vpop.permute.xlu0 %560 }
 0x103   : > { %v571_v41 = vpop.permute.xlu1 %570  ;;  %v578_v44 = vmul.f32 %v576_v42, %v561_v40  ;;  %v777_v40 = vld [vmem:[%s1809_s6 + $0x30] sm:$0xff] }
 0x104   : > { %v580_v62 = vmul.f32 %v576_v42, %v571_v41 }
 0x105   : > { %v606_v50 = vadd.f32 %v602_v46, %v578_v44 }
 0x106   : > { %v566_v45 = vpop.permute.xlu0 %565 }
 0x107   : > { %v579_v55 = vmul.f32 %v576_v42, %v566_v45 }
 0x108   : > { %v595_v48 = vpop.permute.xlu1 %594 }
 0x109   : > { %v604_v58 = vmul.f32 %v600_v43, %v595_v48  ;;  %v607_v0 = vadd.f32 %v603_v57, %v579_v55  ;;  %v778_v43 = vld [vmem:[%s1809_s6 + $0x38] sm:$0xff]  ;;  %s1144_s6 = sshll.u32 %s1509_s26, 2  ;;  %s2163_s26 = sld [smem:[#allocation30_spill]] }
 0x10a   : > { %v621_v51 = vpop.permute.xlu0 %620  ;;  %s942_s28 = sadd.s32 %s1144_s6, %s1818_s10  ;;  %s1959_s10 = sadd.s32 %s1505_s25, %s1146_s16 }
 0x10b   : > { %v634_v52 = vadd.f32 %v621_v51, %v606_v50  ;;  %v608_v2 = vadd.f32 %v604_v58, %v580_v62  ;;  %s1145_s19 = sshll.u32 %s942_s28, 4  ;;  %s2167_s25 = smov %s2162_s29 }
 0x10c   : > { %s1147_s6 = sshll.u32 %s1959_s10, 4  ;;  %s961_s28 = sshll.u32 %s1839_s24, 4  ;;  %s2010_s28 = int_to_ptr.vmem [resolvable:$true] %s961_s28 }
 0x10d   : > { %v616_v54 = vpop.permute.xlu1 %615  ;;  %v638_v59 = vmax.f32 %v634_v52, 0.0  ;;  %s1359_s16 = sshll.u32 %s1534_s14, 4  ;;  %s1360_s16 = int_to_ptr.vmem [resolvable:$false] %s1359_s16 }
 0x10e   : > { %v633_v56 = vadd.f32 %v616_v54, %v605_v53  ;;  %v790_v10 = vpop.permute.xlu0 %789  ;;  %p1362_p12 = scmp.lt.s32.totalorder %s1966_s8, %s1360_s16 }
 0x10f   : > { %v827_v22 = vmul.f32 %v790_v10, %v771_v18  ;;  %s2164_s1 = smov %s2163_s26  ;;  %s1964_s9 = scalar_lea.hbm %s2163_s26, %s1145_s19 }
 0x110   : > { %v637_v60 = vmax.f32 %v633_v56, 0.0  ;;  %s1361_s19 = scalar_lea.vmem %s1360_s16, 32 }
 0x111   : > { %v626_v61 = vpop.permute.xlu1 %625  ;;  %p1363_p6 = scmp.lt.s32.totalorder %s1361_s19, %s1355_s17 }
 0x112   : > { %v1172_v63 = vpack.c.bf16 %v638_v59, %v637_v60  ;;  %v635_v1 = vadd.f32 %v626_v61, %v607_v0  ;;  %v800_v11 = vpop.permute.xlu0 %799 }
 0x113   : > { %v829_v28 = vmul.f32 %v800_v11, %v773_v23  ;;  %p1364_p2 = por %p1363_p6, %p1362_p12 }
 0x114   : > { %1173 = vmatprep.subr.bf16.mxu0 %v1172_v63  ;;  %1180 = vmatprep.subr.bf16.mxu1 %v1172_v63  ;;  %v639_v5 = vmax.f32 %v635_v1, 0.0 }
 0x115   : > { %v631_v3 = vpop.permute.xlu1 %630  ;;  %1175 = vmatpush3.bf16.msra.mxu0 %v1172_v63  ;;  %1182 = vmatpush3.bf16.msra.mxu1 %v1172_v63  ;;  %p1365_p3 = pnand %p1364_p2, %p1358_p9 }
 0x116   : > { %v636_v4 = vadd.f32 %v631_v3, %v608_v2  ;;  %v657_v13 = vpop.permute.xlu0 %656 }
 0x118   : > { %v640_v6 = vmax.f32 %v636_v4, 0.0 }
 0x119   : > { %v795_v12 = vpop.permute.xlu1 %794 }
 0x11a   : > { %v1176_v7 = vpack.c.bf16 %v640_v6, %v639_v5  ;;  %v662_v15 = vpop.permute.xlu0 %661  ;;  %v828_v20 = vmul.f32 %v795_v12, %v772_v17 }
 0x11c   : > { %1177 = vmatprep.subr.bf16.mxu0 %v1176_v7  ;;  %1181 = vmatprep.subr.bf16.mxu1 %v1176_v7  ;;  %v835_v25 = vadd.f32 %v828_v20, %v827_v22 }
 0x11d   : > { %1179 = vmatpush3.bf16.msra.mxu0 %v1176_v7  ;;  %1183 = vmatpush3.bf16.msra.mxu1 %v1176_v7  ;;  %v652_v14 = vpop.permute.xlu1 %651 }
 0x11e   : > { %v667_v19 = vpop.permute.xlu0 %666  ;;  %v836_v32 = vadd.f32 %v835_v25, %v829_v28 }
 0x120   : > { %1167 = vmatmul.mubr.msk.f32.vlgmr.msra.gmra.mrb[0].mxu0 %vm669_vm0, %v642_v8  ;;  %1170 = vmatmul.mubr.msk.f32.vlgmr.msra.gmra.mrb[0].mxu1 %vm669_vm0, %v644_v9 }
 0x121   : > { %v805_v16 = vpop.permute.xlu1 %804 }
 0x122   : > { %v855_v26 = vpop.permute.xlu0 %854  ;;  %v830_v29 = vmul.f32 %v805_v16, %v774_v24 }
 0x124   : > { %v837_v35 = vadd.f32 %v836_v32, %v830_v29 }
 0x125   : > { %v810_v21 = vpop.permute.xlu1 %809 }
 0x126   : > { %v831_v33 = vmul.f32 %v810_v21, %v775_v27  ;;  %v820_v38 = vpop.permute.xlu0 %819 }
 0x127   : > { %v833_v42 = vmul.f32 %v820_v38, %v777_v40 }
 0x128   : > { %v838_v39 = vadd.f32 %v837_v35, %v831_v33 }
 0x129   : > { %v815_v31 = vpop.permute.xlu1 %814 }
 0x12a   : > { %v832_v36 = vmul.f32 %v815_v31, %v776_v30  ;;  %v825_v44 = vpop.permute.xlu0 %824 }
 0x12b   : > { %v834_v47 = vmul.f32 %v825_v44, %v778_v43 }
 0x12c   : > { %v839_v41 = vadd.f32 %v838_v39, %v832_v36 }
 0x12d   : > { %v860_v46 = vpop.permute.xlu1 %859 }
 0x12e   : > { %v840_v45 = vadd.f32 %v839_v41, %v833_v42  ;;  %v890_v16 = vpop.permute.xlu0 %889  ;;  %v915_v42 = vld [vmem:[%s1839_s24] sm:$0x1] }
 0x130   : > { %v841_v48 = vadd.f32 %v840_v45, %v834_v47 }
 0x131   : > { %v865_v57 = vpop.permute.xlu1 %864 }
 0x132   : > { %v842_v59 = vrot.slane %v841_v48, 4 }
 0x134   : > { %v843_v1 = vadd.f32 %v842_v59, %v841_v48 }
 0x135   : > { %v870_v4 = vpop.permute.xlu1 %869 }
 0x136   : > { %v844_v7 = vrot.slane %v843_v1, 2 }
 0x138   : > { %v845_v10 = vadd.f32 %v844_v7, %v843_v1 }
 0x1f3   : > { %v1168_v49 = vpop.f32.mrb[0].mxu0  ;;  %v1171_v50 = vpop.f32.mrb[0].mxu1 }
 0x1f4   : > { %v754_v51 = vadd.f32 %v1168_v49, %v657_v13  ;;  %v748_v52 = vpop.f32.mrb[1].mxu0  ;;  %v758_v53 = vpop.f32.mrb[1].mxu1  ;;  %v764_v54 = vadd.f32 %v1171_v50, %v667_v19  ;;  %v846_v13 = vrot.slane %v845_v10, 1  ;;  %v895_v19 = vrot.slane %v890_v16, %v575_v37 }
 0x1f5   : > { %v749_v55 = vadd.f32 %v748_v52, %v652_v14  ;;  %v759_v56 = vadd.f32 %v758_v53, %v662_v15 }
 0x1f6   : > { %v768_v58 = vmax.f32 %v754_v51, 0.0  ;;  %v770_v63 = vmax.f32 %v764_v54, 0.0  ;;  %v847_v17 = vadd.f32 %v846_v13, %v845_v10 }
 0x1f7   : > { %v767_v60 = vmax.f32 %v749_v55, 0.0  ;;  %v769_v61 = vmax.f32 %v759_v56, 0.0 }
 0x1f8   : > { %v873_v62 = vmul.f32 %v860_v46, %v768_v58  ;;  %v875_v5 = vmul.f32 %v870_v4, %v770_v63 }
 0x1f9   : > { %v872_v0 = vmul.f32 %v855_v26, %v767_v60  ;;  %v874_v3 = vmul.f32 %v865_v57, %v769_v61 }
 0x1fb   : > { %v876_v2 = vadd.f32 %v873_v62, %v872_v0 }
 0x1fd   : > { %v877_v6 = vadd.f32 %v876_v2, %v874_v3 }
 0x1ff   : > { %v878_v8 = vadd.f32 %v877_v6, %v875_v5 }
 0x201   : > { %v879_v9 = vrot.slane %v878_v8, 4 }
 0x203   : > { %v880_v11 = vadd.f32 %v879_v9, %v878_v8 }
 0x205   : > { %v881_v12 = vrot.slane %v880_v11, 2 }
 0x207   : > { %v882_v14 = vadd.f32 %v881_v12, %v880_v11 }
 0x209   : > { %v883_v15 = vrot.slane %v882_v14, 1 }
 0x20b   : > { %v884_v18 = vadd.f32 %v883_v15, %v882_v14 }
 0x20d   : > { %v885_v20 = vadd.f32 %v884_v18, %v847_v17 }
 0x20f   : > { %v896_v21 = vadd.f32 %v895_v19, %v885_v20 }
 0x211   : > { %v898_v22 = vand.u32 2147483647, %v896_v21  ;;  %v902_v28 = vmax.f32 %v896_v21, 0.0  ;;  %v903_v29 = vmul.f32 %v897_v34, %v896_v21  ;;  %vm921_vm1 = vcmp.ge.f32.partialorder %v896_v21, 0.0 }
 0x213   : > { %v899_v23 = vsub.f32 0.0, %v898_v22  ;;  %v904_v39 = vsub.f32 %v902_v28, %v903_v29 }
 0x215   : > { %v900_v24 = vmul.f32 1.442695, %v899_v23 }
 0x217   : > { %1319 = vpow2.f32 %v900_v24 }
 0x221   : > { %v1320_v25 = vpop.eup %1319 }
 0x222   : > { %v905_v26 = vadd.f32 1.0, %v1320_v25  ;;  %v908_v27 = vmul.f32 -0.5, %v1320_v25  ;;  %v911_v30 = vand.u32 2147483647, %v1320_v25 }
 0x224   : > { %1321 = vrcp.f32 %v905_v26  ;;  %v909_v37 = vadd.f32 1.0, %v908_v27  ;;  %vm1968_vm2 = vcmp.lt.f32.partialorder %v911_v30, 0.0004427343 }
 0x225   : > { %1323 = vlog2.f32 %v905_v26 }
 0x226   : > { %v910_v36 = vmul.f32 %v1320_v25, %v909_v37 }
 0x22e   : > { %v1322_v31 = vpop.eup %1321 }
 0x22f   : > { %v1324_v32 = vpop.eup %1323  ;;  %v922_v33 = vmul.f32 %v1322_v31, %v1320_v25 }
 0x230   : > { %v907_v35 = vmul.f32 0.6931472, %v1324_v32 }
 0x231   : > { %v923_v38 = vsel %vm921_vm1, %v1322_v31, %v922_v33 }
 0x232   : > { %924 = vst [vmem:[%s2167_s25] sm:$0x1] %v923_v38  ;;  %v913_v41 = vsel %vm1968_vm2, %v910_v36, %v907_v35 }
 0x233   : > { %1368 = shalt.err (!%p1365_p3)
}
 0x234   : > { %s1369_s27 = scalar_lea.hbm %s1964_s9, 16  ;;  %s1373_s18 = scalar_lea.hbm %s2164_s1, 128 }
 0x235   : > { %p1370_p13 = scmp.ne.s32.totalorder %s1964_s9, %s1369_s27  ;;  %p1374_p11 = scmp.lt.u32.totalorder %s1964_s9, %s2164_s1 }
 0x236   : > { %p1375_p1 = scmp.lt.u32.totalorder %s1373_s18, %s1369_s27  ;;  %p1377_p7 = scmp.lt.u32.totalorder %s1369_s27, %s1964_s9 }
 0x237   : > { %p1371_p4 = pnand %p1370_p13, %p2168_p0 }
 0x238   : > { %p1376_p8 = por %p1375_p1, %p1374_p11 }
 0x239   : > { %p1372_p10 = pneg %p1371_p4 }
 0x23a   : > { %p1378_p5 = por %p1377_p7, %p1376_p8 }
 0x23c   : > { %p1379_p9 = pnand %p1378_p5, %p1372_p10 }
 0x23e   : > { %1382 = shalt.err (!%p1379_p9)
}
 0x23f   : > { %1186 = dma.vmem_to_hbm [thread:$0]  (%p2168_p0), %s1966_s8, 16, %s1964_s9, %s926_s0   ;;  %v914_v43 = vadd.f32 %v913_v41, %v904_v39 }
 0x240   : > { %s2169_s16 = sld [smem:[#allocation31_spill]]  ;;  %s2170_s12 = sand.u32 1, %s1481_s20  }
 0x241   : > { %v916_v44 = vadd.f32 %v915_v42, %v914_v43  ;;  %s930_s27 = scalar_lea.sflag [#allocation8], %s2170_s12  ;;  %s1383_s29 = scalar_lea.vmem %s2010_s28, 16 }
 0x242   : > { %p1384_p12 = scmp.ne.s32.totalorder %s2010_s28, %s1383_s29  ;;  %p2171_p0 = scmp.ne.s32.totalorder %s2147_s15, 0 }
 0x243   : > { %917 = vst [vmem:[%s1839_s24] sm:$0x1] %v916_v44  ;;  %s1535_s8 = smov [#allocation7]  }
 0x244   : > { %p1385_p6 = pnand %p1384_p12, %p2171_p0  ;;  %s1387_s10 = sshll.u32 %s1535_s8, 4  ;;  %s1388_s10 = int_to_ptr.vmem [resolvable:$false] %s1387_s10 }
 0x245   : > { %s1389_s9 = scalar_lea.vmem %s1388_s10, 32  ;;  %p1390_p3 = scmp.lt.s32.totalorder %s2010_s28, %s1388_s10 }
 0x246   : > { %s2006_s19 = scalar_lea.hbm %s2169_s16, %s1147_s6  ;;  %p1386_p2 = pneg %p1385_p6 }
 0x247   : > { %p1391_p13 = scmp.lt.s32.totalorder %s1389_s9, %s1383_s29 }
 0x249   : > { %p1392_p4 = por %p1391_p13, %p1390_p3 }
 0x24b   : > { %p1393_p10 = pnand %p1392_p4, %p1386_p2 }
 0x24d   : > { %1396 = shalt.err (!%p1393_p10)
}
 0x24e   : > { %s1397_s24 = scalar_lea.hbm %s2006_s19, 16  ;;  %s1401_s5 = scalar_lea.hbm %s2169_s16, 64 }
 0x24f   : > { %p1398_p11 = scmp.ne.s32.totalorder %s2006_s19, %s1397_s24  ;;  %p1402_p7 = scmp.lt.u32.totalorder %s2006_s19, %s2169_s16 }
 0x250   : > { %p1403_p5 = scmp.lt.u32.totalorder %s1401_s5, %s1397_s24  ;;  %p1405_p12 = scmp.lt.u32.totalorder %s1397_s24, %s2006_s19 }
 0x251   : > { %p1399_p1 = pnand %p1398_p11, %p2171_p0 }
 0x252   : > { %p1404_p9 = por %p1403_p5, %p1402_p7 }
 0x253   : > { %p1400_p8 = pneg %p1399_p1 }
 0x254   : > { %p1406_p6 = por %p1405_p12, %p1404_p9 }
 0x256   : > { %p1407_p2 = pnand %p1406_p6, %p1400_p8 }
 0x258   : > { %1410 = shalt.err (!%p1407_p2)
}
 0x259   : > { %1187 = dma.vmem_to_hbm [thread:$0]  (%p2171_p0), %s2010_s28, 16, %s2006_s19, %s930_s27  }
 0x25a PF: > { %p1202_p3 = scmp.ge.s32.totalorder %s1525_s30, 2  ;;  %s973_s25 = sand.u32 1, %s1489_s22  }
 0x25b   : > { %p2172_p13 = scmp.ne.s32.totalorder %s2144_s13, 0  ;;  %s974_s17 = scalar_lea.sflag [#allocation5], %s973_s25 }
 0x25d   : > { %p1195_p4 = pnand %p1202_p3, %p2172_p13 }
 0x25f   : > { %1468 = dma.done.wait (!%p1195_p4), %s974_s17, 16  }
 0x260   : > { %1470 = vsyncadd (!%p1195_p4), %s974_s17, 4294967280  ;;  %s2173_s14 = sld [smem:[#allocation12_spill]]  ;;  %p2174_p10 = scmp.ne.s32.totalorder %s2148_s7, 0 }
 0x262   : > { %p1198_p11 = pnand %p1202_p3, %p2174_p10 }
 0x266   : > { %s981_s12 = sand.u32 1, %s2173_s14  }
 0x267   : > { %s982_s15 = scalar_lea.sflag [#allocation8], %s981_s12 }
 0x268   : > { %1472 = dma.done.wait (!%p1198_p11), %s982_s15, 16  }
 0x269   : > { %1474 = vsyncadd (!%p1198_p11), %s982_s15, 4294967280  ;;  %s33_s30 = sadd.s32 1, %s1525_s30   ;;  %s2176_s22 = sld [smem:[#allocation21_spill]] }
 0x26a   : > { %p2044_p0 = scmp.ge.s32.totalorder %s33_s30, 10   ;;  %s2177_s13 = sld [smem:[#allocation13_spill]] }
 0x26b   : > { %s2178_s24 = sld [smem:[#allocation20_spill]]  ;;  %s2179_s9 = sld [smem:[#allocation14_spill]] }
 0x26c   : > { %s2180_s25 = sld [smem:[#allocation15_spill]]  ;;  %s2181_s26 = sld [smem:[#allocation16_spill]] }
 0x26d   : > { %s2182_s27 = sld [smem:[#allocation17_spill]]  ;;  %s2183_s7 = sld [smem:[#allocation18_spill]] }
 0x26e   : > { %s2184_s29 = sld [smem:[#allocation19_spill]]  ;;  %s2186_s19 = smov %s1481_s20 }
 0x26f   : > { %s2187_s20 = smov %s1485_s21  ;;  %s2188_s21 = smov %s2176_s22 }
 0x270   : > { %s2189_s22 = smov %s1493_s23  ;;  %s2190_s23 = smov %s2177_s13 }
 0x271   :  { %32 = sbr.rel (!%p2044_p0) target bundleno = 23 (0x17), region = 132 }
 0x273   : > { %s2191_s28 = smov %s2183_s7 }
 0x278   :  { %986 = vsyncpa [#allocation4], 1 }
 0x279   :  { %988 = vsyncpa [#allocation4 + $0x1], 1 }
 0x27a   :  { %989 = vsyncpa [#allocation5], 1 }
 0x27b   :  { %991 = vsyncpa [#allocation5 + $0x1], 1 }
 0x27c   :  { %992 = vsyncpa [#allocation8], 1 }
 0x27d   :  { %994 = vsyncpa [#allocation8 + $0x1], 1 }

</bundles_post_ra>
